<compile_context>
chip_gen: v7x
topology: tpu7x:2x2x1
jax: 0.10.0
libtpu: 0.0.40
codegen_flags: <defaults>
</compile_context>

<pallas_src>
import functools

import numpy as np
import jax
import jax.numpy as jnp
from jax.experimental import pallas as pl
from jax.experimental.pallas import tpu as pltpu

NX = 13
NY = 13
N_NODES = NX * NY            # 169
BOLTZMANN = 5.67e-8
T_REF = 300.0                # centering constant for the bf16 matmul

MAX_TILE_B = 2048            # review: ~10-11 MiB VMEM at TB=2048 (incl. padding)
TARGET_GRID_STEPS = 4        # review: guarantee grid >= 2 (ideally >= 4)

# flattened node ids used by the reference forward()
HEATER_IDS = np.array([6 * NX + 3, 3 * NX + 6, 9 * NX + 3, 9 * NX + 9], dtype=np.int32)
IFACE_IDS = np.array([0, NX - 1, NX * NX - 1, NX * NX - NX], dtype=np.int32)


def _round_up(x, m):
    return ((x + m - 1) // m) * m


def build_matrices(L=0.1, thickness=0.001, board_k=10.0, ir_emmisivity=0.8):
    """Deterministically rebuild the sparse K and (diagonal) E from __init__,
    densified (float64).  NOTE: faithfully reproduces the reference code,
    including the use of -GLx (not -GLy) for the y-direction off-diagonal
    couplings."""
    interfaces = set(int(v) for v in IFACE_IDS)
    dx = L / (NX - 1)
    dy = L / (NY - 1)
    GLx = thickness * board_k * dy / dx
    GLy = thickness * board_k * dx / dy
    GR = 2.0 * dx * dy * ir_emmisivity

    K = np.zeros((N_NODES, N_NODES), dtype=np.float64)
    for j in range(NY):
        for i in range(NX):
            idx = i + NX * j
            if idx in interfaces:
                K[idx, idx] += 1.0
            else:
                GLii = 0.0
                if i + 1 < NX:
                    K[idx, idx + 1] += -GLx
                    GLii += GLx
                if i - 1 >= 0:
                    K[idx, idx - 1] += -GLx
                    GLii += GLx
                if j + 1 < NY:
                    K[idx, idx + NX] += -GLx   # (sic) reference uses GLx here
                    GLii += GLy
                if j - 1 >= 0:
                    K[idx, idx - NX] += -GLx   # (sic) reference uses GLx here
                    GLii += GLy
                K[idx, idx] += GLii

    e_diag = np.zeros((N_NODES,), dtype=np.float64)
    for idx in range(N_NODES):
        if idx not in interfaces:
            e_diag[idx] = GR
    return K, e_diag


def excess_energy_kernel(t_ref, tenv_ref, hq_ref, kt_ref, sel_ref, coeff_ref,
                         out_ref, *, mask_last, last_tile, valid_rows):
    # t_ref, tenv_ref : (TB, N) f32      hq_ref : (TB, 8) f32
    # kt_ref : (N, N) bf16 = K^T         sel_ref : (8, N) f32 one-hot rows
    # coeff_ref : (2, N) f32  [row0 = sigma*diag(E), row1 = T_REF * (K @ 1)]
    T = t_ref[...]
    # conduction: K @ T_i for every sample i == T @ K^T, run in bf16 on the MXU
    # on centered temperatures + exact f32 row-sum correction.
    t_centered = (T - T_REF).astype(jnp.bfloat16)
    cond = jnp.dot(t_centered, kt_ref[...], preferred_element_type=jnp.float32)
    cond = cond + coeff_ref[1:2, :]

    # radiation: sigma * E @ (T^4 - Tenv^4); E diagonal -> elementwise,
    # sigma already folded into coeff row 0; T**4 via two squarings.
    Te = tenv_ref[...]
    t2 = T * T
    e2 = Te * Te
    rad = (t2 * t2 - e2 * e2) * coeff_ref[0:1, :]

    # Q built in-kernel from the 8 scattered values (heater/interface ids are
    # disjoint, so the reference's if/elif reduces to a plain sum of one-hots).
    q = jnp.dot(hq_ref[...], sel_ref[...], preferred_element_type=jnp.float32)

    absx = jnp.abs(cond + rad - q)
    zeros = jnp.zeros(out_ref.shape, out_ref.dtype)

    if mask_last:
        # Only the LAST tile contains batch-padding rows; gate the mask work
        # so every other tile takes the cheap path (review: ~10-20% VPU win
        # on v6e/v7x).
        i = pl.program_id(0)

        @pl.when(i != last_tile)
        def _():
            out_ref[...] = zeros + jnp.sum(absx)

        @pl.when(i == last_tile)
        def _():
            rows = jax.lax.broadcasted_iota(jnp.int32, absx.shape, 0)
            masked = jnp.where(rows < valid_rows, absx, 0.0)
            out_ref[...] = zeros + jnp.sum(masked)
    else:
        out_ref[...] = zeros + jnp.sum(absx)


def la_energia_no_aparece(outputs, heaters, interfaces, Tenv, K_dense, e_diag):
    """Forward pass: mean(|K T + sigma E (T^4 - Tenv^4) - Q|) (scalar)."""
    B = outputs.shape[0]
    T = jnp.reshape(outputs, (B, N_NODES)).astype(jnp.float32)
    Tenv = jnp.asarray(Tenv, jnp.float32).reshape(B, N_NODES)
    hq = jnp.concatenate([jnp.asarray(heaters, jnp.float32),
                          jnp.asarray(interfaces, jnp.float32)], axis=1)  # (B, 8)

    # Batch tiling: aim for >= TARGET_GRID_STEPS grid steps (pipelining + v7x
    # megacore) while capping the tile at MAX_TILE_B; pad to a TB multiple and
    # mask the padded rows (last tile only) inside the kernel.
    tb = min(MAX_TILE_B, max(8, _round_up(-(-B // TARGET_GRID_STEPS), 8)))
    b_pad = _round_up(B, tb)
    grid = b_pad // tb
    if b_pad != B:
        pad = ((0, b_pad - B), (0, 0))
        T = jnp.pad(T, pad)
        Tenv = jnp.pad(Tenv, pad)
        hq = jnp.pad(hq, pad)

    # constant, VMEM-resident operands
    K64 = np.asarray(K_dense, np.float64)
    kt_bf16 = jnp.asarray(K64.T, jnp.float32).astype(jnp.bfloat16)          # (N, N)
    coeff = jnp.asarray(
        np.stack([BOLTZMANN * np.asarray(e_diag, np.float64),
                  T_REF * K64.sum(axis=1)]), jnp.float32)                    # (2, N)
    sel_np = np.zeros((8, N_NODES), np.float32)
    sel_np[np.arange(4), HEATER_IDS] = 1.0
    sel_np[np.arange(4, 8), IFACE_IDS] = 1.0
    sel = jnp.asarray(sel_np)                                                # (8, N)

    kernel = functools.partial(
        excess_energy_kernel,
        mask_last=(b_pad != B),
        last_tile=grid - 1,
        valid_rows=B - (grid - 1) * tb,
    )

    # Advisory cost estimate so XLA overlaps this call correctly.
    flops = (2 * b_pad * N_NODES * N_NODES      # conduction matmul
             + 2 * b_pad * 8 * N_NODES          # Q selection matmul
             + 13 * b_pad * N_NODES)            # elementwise radiation/residual
    bytes_accessed = (b_pad * (2 * N_NODES + 8) * 4    # T, Tenv, hq streams
                      + N_NODES * N_NODES * 2          # K^T (bf16, once)
                      + 10 * N_NODES * 4               # sel + coeff (once)
                      + grid * 8 * 128 * 4)            # per-tile partials out
    cost = pl.CostEstimate(flops=flops, transcendentals=0,
                           bytes_accessed=bytes_accessed)

    partials = pl.pallas_call(
        kernel,
        out_shape=jax.ShapeDtypeStruct((grid, 8, 128), jnp.float32),
        grid=(grid,),
        in_specs=[
            pl.BlockSpec((tb, N_NODES), lambda i: (i, 0)),            # T
            pl.BlockSpec((tb, N_NODES), lambda i: (i, 0)),            # Tenv
            pl.BlockSpec((tb, 8), lambda i: (i, 0)),                  # heaters|interfaces
            pl.BlockSpec((N_NODES, N_NODES), lambda i: (0, 0)),       # K^T (bf16, resident)
            pl.BlockSpec((8, N_NODES), lambda i: (0, 0)),             # Q selection (resident)
            pl.BlockSpec((2, N_NODES), lambda i: (0, 0)),             # coeffs (resident)
        ],
        out_specs=pl.BlockSpec((1, 8, 128), lambda i: (i, 0, 0)),
        compiler_params=pltpu.CompilerParams(
            dimension_semantics=("parallel",),
            vmem_limit_bytes=32 * 1024 * 1024),
        cost_estimate=cost,
    )(T, Tenv, hq, kt_bf16, sel, coeff)

    return jnp.sum(partials[:, 0, 0]) / jnp.float32(B * N_NODES)


def _numpy_reference(outputs, heaters, interfaces, Tenv, K_dense, e_diag):
    B = outputs.shape[0]
    T = np.asarray(outputs, np.float64).reshape(B, N_NODES)
    Tenv = np.asarray(Tenv, np.float64)
    Q = np.zeros((B, N_NODES), np.float64)
    Q[:, HEATER_IDS] = np.asarray(heaters, np.float64)
    Q[:, IFACE_IDS] = np.asarray(interfaces, np.float64)
    K = np.asarray(K_dense, np.float64)
    e = np.asarray(e_diag, np.float64)
    excess = T @ K.T + BOLTZMANN * (T ** 4 - Tenv ** 4) * e[None, :] - Q
    return np.mean(np.abs(excess))


if __name__ == "__main__":
    B = 2
    key = jax.random.PRNGKey(0)
    k1, k2, k3, k4 = jax.random.split(key, 4)

    # outputs is the (NCHW-style) temperature field map, flattened in forward()
    outputs = jax.random.uniform(k1, (B, 1, 13, 13), jnp.float32, 250.0, 350.0)
    heaters = jax.random.uniform(k2, (B, 4), jnp.float32, 0.0, 5.0)
    interfaces = jax.random.uniform(k3, (B, 4), jnp.float32, 0.0, 2.0)
    Tenv = jax.random.uniform(k4, (B, N_NODES), jnp.float32, 270.0, 300.0)

    K_dense, e_diag = build_matrices()

    result = la_energia_no_aparece(outputs, heaters, interfaces, Tenv, K_dense, e_diag)
    result = jax.block_until_ready(result)

    ref = _numpy_reference(np.asarray(outputs), np.asarray(heaters),
                           np.asarray(interfaces), np.asarray(Tenv),
                           K_dense, e_diag)
    # Tolerance accounts for the bf16 MXU conduction matmul (centered at 300 K
    # with an exact f32 row-sum correction); observed error is O(1e-3) relative
    # for temperatures in the 250-350 K range.
    np.testing.assert_allclose(float(result), ref, rtol=5e-3, atol=1e-4)

    print("KERNEL_OK")
</pallas_src>

<mosaic_0001>
module attributes {stable_mosaic.version = 11 : i64} {
  func.func @excess_energy_kernel(%arg0: i32, %arg1: memref<8x169xf32, #tpu.memory_space<vmem>>, %arg2: memref<8x169xf32, #tpu.memory_space<vmem>>, %arg3: memref<8x8xf32, #tpu.memory_space<vmem>>, %arg4: memref<169x169xbf16, #tpu.memory_space<vmem>>, %arg5: memref<8x169xf32, #tpu.memory_space<vmem>>, %arg6: memref<2x169xf32, #tpu.memory_space<vmem>>, %arg7: memref<1x8x128xf32, #tpu.memory_space<vmem>>) attributes {dimension_semantics = [#tpu.dimension_semantics<parallel>], iteration_bounds = array<i64: 1>, scalar_prefetch = 0 : i64, scratch_operands = 0 : i64, tpu.core_type = #tpu.core_type<tc>, window_params = [{transform_indices = @transform_0, window_bounds = array<i64: 8, 169>}, {transform_indices = @transform_1, window_bounds = array<i64: 8, 169>}, {transform_indices = @transform_2, window_bounds = array<i64: 8, 8>}, {pipeline_mode = #tpu.pipeline_mode<synchronous>, transform_indices = @transform_3, window_bounds = array<i64: 169, 169>}, {pipeline_mode = #tpu.pipeline_mode<synchronous>, transform_indices = @transform_4, window_bounds = array<i64: 8, 169>}, {pipeline_mode = #tpu.pipeline_mode<synchronous>, transform_indices = @transform_5, window_bounds = array<i64: 2, 169>}, {transform_indices = @transform_6, window_bounds = array<i64: 1, 8, 128>}]} {
    %c0 = arith.constant 0 : index
    %c0_0 = arith.constant 0 : index
    %0 = vector.load %arg1[%c0, %c0_0] : memref<8x169xf32, #tpu.memory_space<vmem>>, vector<8x169xf32>
    %cst = arith.constant 3.000000e+02 : f32
    %1 = vector.broadcast %cst : f32 to vector<8x169xf32>
    %2 = arith.subf %0, %1 : vector<8x169xf32>
    %3 = arith.truncf %2 : vector<8x169xf32> to vector<8x169xbf16>
    %c0_1 = arith.constant 0 : index
    %c0_2 = arith.constant 0 : index
    %4 = vector.load %arg4[%c0_1, %c0_2] : memref<169x169xbf16, #tpu.memory_space<vmem>>, vector<169x169xbf16>
    %cst_3 = arith.constant dense<0.000000e+00> : vector<8x169xf32>
    %5 = tpu.matmul %3, %4, %cst_3 {dimension_numbers = #tpu.dot_dimension_numbers<[1], [0], [0], [1], [0, 0, 1, 1], [], []>} : vector<8x169xbf16>, vector<169x169xbf16>, vector<8x169xf32> -> vector<8x169xf32>
    %c1 = arith.constant 1 : index
    %c0_4 = arith.constant 0 : index
    %6 = vector.load %arg6[%c1, %c0_4] : memref<2x169xf32, #tpu.memory_space<vmem>>, vector<1x169xf32>
    %7 = vector.broadcast %6 : vector<1x169xf32> to vector<8x169xf32>
    %8 = arith.addf %5, %7 : vector<8x169xf32>
    %c0_5 = arith.constant 0 : index
    %c0_6 = arith.constant 0 : index
    %9 = vector.load %arg2[%c0_5, %c0_6] : memref<8x169xf32, #tpu.memory_space<vmem>>, vector<8x169xf32>
    %10 = arith.mulf %0, %0 : vector<8x169xf32>
    %11 = arith.mulf %9, %9 : vector<8x169xf32>
    %12 = arith.mulf %10, %10 : vector<8x169xf32>
    %13 = arith.mulf %11, %11 : vector<8x169xf32>
    %14 = arith.subf %12, %13 : vector<8x169xf32>
    %c0_7 = arith.constant 0 : index
    %c0_8 = arith.constant 0 : index
    %15 = vector.load %arg6[%c0_7, %c0_8] : memref<2x169xf32, #tpu.memory_space<vmem>>, vector<1x169xf32>
    %16 = vector.broadcast %15 : vector<1x169xf32> to vector<8x169xf32>
    %17 = arith.mulf %14, %16 : vector<8x169xf32>
    %c0_9 = arith.constant 0 : index
    %c0_10 = arith.constant 0 : index
    %18 = vector.load %arg3[%c0_9, %c0_10] : memref<8x8xf32, #tpu.memory_space<vmem>>, vector<8x8xf32>
    %c0_11 = arith.constant 0 : index
    %c0_12 = arith.constant 0 : index
    %19 = vector.load %arg5[%c0_11, %c0_12] : memref<8x169xf32, #tpu.memory_space<vmem>>, vector<8x169xf32>
    %cst_13 = arith.constant dense<0.000000e+00> : vector<8x169xf32>
    %20 = tpu.matmul %18, %19, %cst_13 {dimension_numbers = #tpu.dot_dimension_numbers<[1], [0], [0], [1], [0, 0, 1, 1], [], []>} : vector<8x8xf32>, vector<8x169xf32>, vector<8x169xf32> -> vector<8x169xf32>
    %21 = arith.addf %8, %17 : vector<8x169xf32>
    %22 = arith.subf %21, %20 : vector<8x169xf32>
    %23 = math.absf %22 : vector<8x169xf32>
    %cst_14 = arith.constant 0.000000e+00 : f32
    %24 = vector.broadcast %cst_14 : f32 to vector<1x8x128xf32>
    %c0_i32 = arith.constant 0 : i32
    %25 = arith.cmpi ne, %arg0, %c0_i32 : i32
    %26 = arith.extui %25 : i1 to i32
    %c0_i32_15 = arith.constant 0 : i32
    %27 = arith.cmpi ne, %26, %c0_i32_15 : i32
    scf.if %27 {
      %31 = vector.shape_cast %23 : vector<8x169xf32> to vector<1x8x169xf32>
      %cst_18 = arith.constant dense<0.000000e+00> : vector<1xf32>
      %32 = vector.multi_reduction <add>, %31, %cst_18 [1, 2] : vector<1x8x169xf32> to vector<1xf32>
      %33 = vector.shape_cast %32 : vector<1xf32> to vector<1x1x1xf32>
      %34 = vector.extract %33[0, 0, 0] : f32 from vector<1x1x1xf32>
      %35 = vector.broadcast %34 : f32 to vector<1x8x128xf32>
      %36 = arith.addf %24, %35 : vector<1x8x128xf32>
      %c0_19 = arith.constant 0 : index
      %c0_20 = arith.constant 0 : index
      %c0_21 = arith.constant 0 : index
      %37 = vector.load %arg7[%c0_19, %c0_20, %c0_21] : memref<1x8x128xf32, #tpu.memory_space<vmem>>, vector<1x8x128xf32>
      tpu.vector_store %arg7[%c0_19, %c0_20, %c0_21], %36 {strides = array<i32>} : memref<1x8x128xf32, #tpu.memory_space<vmem>>, vector<1x8x128xf32>,
    } else {
    }
    %c0_i32_16 = arith.constant 0 : i32
    %28 = arith.cmpi eq, %arg0, %c0_i32_16 : i32
    %29 = arith.extui %28 : i1 to i32
    %c0_i32_17 = arith.constant 0 : i32
    %30 = arith.cmpi ne, %29, %c0_i32_17 : i32
    scf.if %30 {
      %31 = tpu.iota {dimensions = array<i32: 0>} : vector<8x169xi32>
      %c2_i32 = arith.constant 2 : i32
      %32 = vector.broadcast %c2_i32 : i32 to vector<8x169xi32>
      %33 = arith.cmpi slt, %31, %32 : vector<8x169xi32>
      %cst_18 = arith.constant 0.000000e+00 : f32
      %34 = vector.broadcast %cst_18 : f32 to vector<8x169xf32>
      %35 = arith.select %33, %23, %34 : vector<8x169xi1>, vector<8x169xf32>
      %36 = vector.shape_cast %35 : vector<8x169xf32> to vector<1x8x169xf32>
      %cst_19 = arith.constant dense<0.000000e+00> : vector<1xf32>
      %37 = vector.multi_reduction <add>, %36, %cst_19 [1, 2] : vector<1x8x169xf32> to vector<1xf32>
      %38 = vector.shape_cast %37 : vector<1xf32> to vector<1x1x1xf32>
      %39 = vector.extract %38[0, 0, 0] : f32 from vector<1x1x1xf32>
      %40 = vector.broadcast %39 : f32 to vector<1x8x128xf32>
      %41 = arith.addf %24, %40 : vector<1x8x128xf32>
      %c0_20 = arith.constant 0 : index
      %c0_21 = arith.constant 0 : index
      %c0_22 = arith.constant 0 : index
      %42 = vector.load %arg7[%c0_20, %c0_21, %c0_22] : memref<1x8x128xf32, #tpu.memory_space<vmem>>, vector<1x8x128xf32>
      tpu.vector_store %arg7[%c0_20, %c0_21, %c0_22], %41 {strides = array<i32>} : memref<1x8x128xf32, #tpu.memory_space<vmem>>, vector<1x8x128xf32>,
    } else {
    }
    return
  }
  func.func @transform_0(%arg0: i32) -> (i32, i32) {
    %c0_i32 = arith.constant 0 : i32
    %c0_i32_0 = arith.constant 0 : i32
    return %arg0, %c0_i32 : i32, i32
  }
  func.func @transform_1(%arg0: i32) -> (i32, i32) {
    %c0_i32 = arith.constant 0 : i32
    %c0_i32_0 = arith.constant 0 : i32
    return %arg0, %c0_i32 : i32, i32
  }
  func.func @transform_2(%arg0: i32) -> (i32, i32) {
    %c0_i32 = arith.constant 0 : i32
    %c0_i32_0 = arith.constant 0 : i32
    return %arg0, %c0_i32 : i32, i32
  }
  func.func @transform_3(%arg0: i32) -> (i32, i32) {
    %c0_i32 = arith.constant 0 : i32
    %c0_i32_0 = arith.constant 0 : i32
    %c0_i32_1 = arith.constant 0 : i32
    return %c0_i32, %c0_i32_0 : i32, i32
  }
  func.func @transform_4(%arg0: i32) -> (i32, i32) {
    %c0_i32 = arith.constant 0 : i32
    %c0_i32_0 = arith.constant 0 : i32
    %c0_i32_1 = arith.constant 0 : i32
    return %c0_i32, %c0_i32_0 : i32, i32
  }
  func.func @transform_5(%arg0: i32) -> (i32, i32) {
    %c0_i32 = arith.constant 0 : i32
    %c0_i32_0 = arith.constant 0 : i32
    %c0_i32_1 = arith.constant 0 : i32
    return %c0_i32, %c0_i32_0 : i32, i32
  }
  func.func @transform_6(%arg0: i32) -> (i32, i32, i32) {
    %c0_i32 = arith.constant 0 : i32
    %c0_i32_0 = arith.constant 0 : i32
    %c0_i32_1 = arith.constant 0 : i32
    return %arg0, %c0_i32, %c0_i32_0 : i32, i32, i32
  }
}

</mosaic_0001>

<bundles_post_ra>
// kernel: tpu_custom_call.1
= control target key start
LH: loop header
LB: loop body
LE: loop exit
PB: predicated region body
PF: predicated region fallthrough
CT: control target
= control target key end

     0   :  { %11 = vsyncpa [#allocation3], 0  ;;  %s801_s0 = inlined_call_operand.hbm [shape: f32[8,169], index: 0, kind: input, shape index: {}]   ;;  %s802_s1 = inlined_call_operand.hbm [shape: f32[8,169], index: 1, kind: input, shape index: {}]   ;;  %s803_s2 = inlined_call_operand.hbm [shape: f32[8,8], index: 2, kind: input, shape index: {}]   ;;  %s804_s3 = inlined_call_operand.hbm [shape: bf16[169,169], index: 3, kind: input, shape index: {}]   ;;  %s805_s4 = inlined_call_operand.hbm [shape: f32[8,169], index: 4, kind: input, shape index: {}]   ;;  %s806_s5 = inlined_call_operand.vmem [shape: f32[2,169], index: 5, kind: input, shape index: {}]   ;;  %s807_s6 = inlined_call_operand.hbm [shape: f32[1,8,128], index: 6, kind: output, shape index: {}]  }
   0x1   :  { %12 = vsyncpa [#allocation6], 0 }
   0x2   :  { %13 = vsyncpa [#allocation9], 0 }
   0x3   :  { %14 = vsyncpa [#allocation4], 0  ;;  %s669_s21 = smov [#allocation5]   ;;  %s670_s23 = smov [#allocation8]  }
   0x4   :  { %s31_s22 = sshll.u32 %s669_s21, 4  ;;  %s50_s24 = sshll.u32 %s670_s23, 4  ;;  %s32_s22 = int_to_ptr.vmem [resolvable:$true] %s31_s22  ;;  %s714_s24 = int_to_ptr.vmem [resolvable:$true] %s50_s24 }
   0x5   :  { %s529_s27 = scalar_lea.hbm %s802_s1, 256 }
   0x6   :  { %p530_p0 = scmp.ne.s32.totalorder %s802_s1, %s529_s27  ;;  %p533_p1 = scmp.lt.u32.totalorder %s529_s27, %s802_s1 }
   0x8   :  { %p535_p2 = pnand %p533_p1, %p530_p0 }
   0xa   :  { %538 = shalt.err (!%p535_p2)
}
   0xb   :  { %s539_s8 = scalar_lea.vmem %s32_s22, 256  ;;  %p544_p4 = scmp.lt.s32.totalorder %s32_s22, %s32_s22 }
   0xc   :  { %p540_p3 = scmp.ne.s32.totalorder %s32_s22, %s539_s8  ;;  %p545_p5 = scmp.lt.s32.totalorder %s539_s8, %s539_s8 }
   0xe   :  { %p546_p6 = por %p545_p5, %p544_p4 }
  0x10   :  { %p547_p7 = pnand %p546_p6, %p540_p3 }
  0x12   :  { %550 = shalt.err (!%p547_p7)
}
  0x13   :  { %34 = dma.hbm_to_vmem [thread:$0]  %s802_s1, 256, %s32_s22, [#allocation6]  }
  0x14   :  { %s551_s13 = scalar_lea.hbm %s804_s3, 2816 }
  0x15   :  { %p552_p8 = scmp.ne.s32.totalorder %s804_s3, %s551_s13  ;;  %p555_p9 = scmp.lt.u32.totalorder %s551_s13, %s804_s3 }
  0x17   :  { %p557_p10 = pnand %p555_p9, %p552_p8 }
  0x19   :  { %560 = shalt.err (!%p557_p10)
}
  0x1a   :  { %s561_s18 = scalar_lea.vmem %s714_s24, 2816  ;;  %p566_p12 = scmp.lt.s32.totalorder %s714_s24, %s714_s24 }
  0x1b   :  { %p562_p11 = scmp.ne.s32.totalorder %s714_s24, %s561_s18  ;;  %p567_p13 = scmp.lt.s32.totalorder %s561_s18, %s561_s18 }
  0x1d   :  { %p568_p0 = por %p567_p13, %p566_p12 }
  0x1f   :  { %p569_p1 = pnand %p568_p0, %p562_p11 }
  0x21   :  { %572 = shalt.err (!%p569_p1)
}
  0x22   :  { %s671_s1 = smov 128   ;;  %s672_s19 = smov 8  }
  0x23   :  { %56 = dma.hbm_to_vmem [thread:$0]  %s804_s3, 2816, %s714_s24, [#allocation9], %s671_s1, %s671_s1, %s672_s19  }
  0x24   :  { %s673_s22 = smov [#allocation2]   ;;  %s674_s25 = smov [#allocation7]  }
  0x25   :  { %s21_s23 = sshll.u32 %s673_s22, 4  ;;  %s41_s26 = sshll.u32 %s674_s25, 4  ;;  %s22_s23 = int_to_ptr.vmem [resolvable:$true] %s21_s23  ;;  %s42_s26 = int_to_ptr.vmem [resolvable:$true] %s41_s26 }
  0x26   :  { %s573_s29 = scalar_lea.hbm %s801_s0, 256 }
  0x27   :  { %p574_p2 = scmp.ne.s32.totalorder %s801_s0, %s573_s29  ;;  %p577_p3 = scmp.lt.u32.totalorder %s573_s29, %s801_s0 }
  0x29   :  { %p579_p4 = pnand %p577_p3, %p574_p2 }
  0x2b   :  { %582 = shalt.err (!%p579_p4)
}
  0x2c   :  { %s583_s3 = scalar_lea.vmem %s22_s23, 256  ;;  %p588_p6 = scmp.lt.s32.totalorder %s22_s23, %s22_s23 }
  0x2d   :  { %p584_p5 = scmp.ne.s32.totalorder %s22_s23, %s583_s3  ;;  %p589_p7 = scmp.lt.s32.totalorder %s583_s3, %s583_s3 }
  0x2f   :  { %p590_p8 = por %p589_p7, %p588_p6 }
  0x31   :  { %p591_p9 = pnand %p590_p8, %p584_p5 }
  0x33   :  { %594 = shalt.err (!%p591_p9)
}
  0x34   :  { %24 = dma.hbm_to_vmem [thread:$0]  %s801_s0, 256, %s22_s23, [#allocation3]  }
  0x35   :  { %s595_s13 = scalar_lea.hbm %s803_s2, 128 }
  0x36   :  { %p596_p10 = scmp.ne.s32.totalorder %s803_s2, %s595_s13  ;;  %p599_p11 = scmp.lt.u32.totalorder %s595_s13, %s803_s2 }
  0x38   :  { %p601_p12 = pnand %p599_p11, %p596_p10 }
  0x3a   :  { %604 = shalt.err (!%p601_p12)
}
  0x3b   :  { %s605_s18 = scalar_lea.vmem %s42_s26, 128  ;;  %p610_p0 = scmp.lt.s32.totalorder %s42_s26, %s42_s26 }
  0x3c   :  { %p606_p13 = scmp.ne.s32.totalorder %s42_s26, %s605_s18  ;;  %p611_p1 = scmp.lt.s32.totalorder %s605_s18, %s605_s18 }
  0x3e   :  { %p612_p2 = por %p611_p1, %p610_p0 }
  0x40   :  { %p613_p3 = pnand %p612_p2, %p606_p13 }
  0x42   :  { %616 = shalt.err (!%p613_p3)
}
  0x43   :  { %44 = dma.hbm_to_vmem [thread:$0]  %s803_s2, 128, %s42_s26, [#allocation6]  }
  0x44   :  { %s675_s19 = smov [#allocation10]   ;;  %s617_s23 = scalar_lea.hbm %s805_s4, 256 }
  0x45   :  { %s63_s20 = sshll.u32 %s675_s19, 4  ;;  %p618_p4 = scmp.ne.s32.totalorder %s805_s4, %s617_s23  ;;  %s64_s20 = int_to_ptr.vmem [resolvable:$true] %s63_s20 }
  0x46   :  { %p621_p5 = scmp.lt.u32.totalorder %s617_s23, %s805_s4 }
  0x48   :  { %p623_p6 = pnand %p621_p5, %p618_p4 }
  0x4a   :  { %626 = shalt.err (!%p623_p6)
}
  0x4b   :  { %s627_s30 = scalar_lea.vmem %s64_s20, 256  ;;  %p632_p8 = scmp.lt.s32.totalorder %s64_s20, %s64_s20 }
  0x4c   :  { %p628_p7 = scmp.ne.s32.totalorder %s64_s20, %s627_s30  ;;  %p633_p9 = scmp.lt.s32.totalorder %s627_s30, %s627_s30 }
  0x4e   :  { %p634_p10 = por %p633_p9, %p632_p8 }
  0x50   :  { %p635_p11 = pnand %p634_p10, %p628_p7 }
  0x52   :  { %638 = shalt.err (!%p635_p11)
}
  0x53   :  { %66 = dma.hbm_to_vmem [thread:$0]  %s805_s4, 256, %s64_s20, [#allocation9]  }
  0x54   :  { %661 = dma.done.wait [#allocation3], 256  }
  0x55   :  { %662 = vsyncadd [#allocation3], 4294967040 }
  0x56   :  { %663 = dma.done.wait [#allocation6], 384  }
  0x57   :  { %664 = vsyncadd [#allocation6], 4294966912 }
  0x58   :  { %665 = dma.done.wait [#allocation9], 3072  }
  0x59   :  { %666 = vsyncadd [#allocation9], 4294964224  ;;  %v676_v0 = vmov 0.0   ;;  %v496_v1 = vld [vmem:[#allocation8 + $0x4] ss:$8 sps:$4 sm:$0xff]   ;;  %v317_v12 = vld [vmem:[#allocation10 + $0x8] sm:$0xff]  ;;  %v116_v39 = vlaneseq }
  0x5a   :  { %386 = vmatprep.mubr.f32.mxu1 %v676_v0  ;;  %v498_v2 = vld [vmem:[#allocation8] ss:$8 sps:$4 sm:$0xff]   ;;  %248 = vmatprep.subr.bf16.mxu0 %v496_v1  ;;  %v499_v3 = vld [vmem:[#allocation8 + $0x14] ss:$8 sps:$4 sm:$0xff]   ;;  %v501_v4 = vld [vmem:[#allocation8 + $0x10] ss:$8 sps:$4 sm:$0xff]  }
  0x5b   :  { %249 = vmatpush1.bf16.msra.mxu0 %v498_v2  ;;  %v502_v5 = vld [vmem:[#allocation8 + $0x24] ss:$8 sps:$4 sm:$0xff]   ;;  %v504_v6 = vld [vmem:[#allocation8 + $0x20] ss:$8 sps:$4 sm:$0xff]   ;;  %v505_v7 = vld [vmem:[#allocation8 + $0x34] ss:$8 sps:$4 sm:$0xff]   ;;  %322 = vmatprep.subr.mxu1 %v317_v12 }
  0x5c   :  { %250 = vmatprep.subr.bf16.mxu0 %v499_v3  ;;  %v507_v8 = vld [vmem:[#allocation8 + $0x30] ss:$8 sps:$4 sm:$0xff]   ;;  %v508_v9 = vld [vmem:[#allocation8 + $0x44] ss:$8 sps:$4 sm:$0xff]   ;;  %v510_v10 = vld [vmem:[#allocation8 + $0x40] ss:$8 sps:$4 sm:$0xff]  }
  0x5d   :  { %v86_v11 = vld [vmem:[#allocation2 + $0x8] sm:$0xff]  ;;  %vm318_vm0 = vcmask 64512   ;;  %v511_v13 = vld [vmem:[#allocation8 + $0x54] ss:$8 sps:$4 sm:$0xff]   ;;  %vm234_vm1 = vcmask 334848   ;;  %vm238_vm2 = vcmask 1043456  }
  0x5e   :  { %v458_v14 = vadd.f32 -300.0, %v86_v11  ;;  %v316_v15 = vld [vmem:[#allocation10] sm:$0xff]  ;;  %v315_v16 = vld [vmem:[#allocation7] sm:$0xff]  ;;  %v514_v19 = vld [vmem:[#allocation8 + $0x64] ss:$8 sps:$4 sm:$0xff]   ;;  %vm239_vm3 = vcmask 1044480   ;;  %v292_v45 = vmul.f32 %v86_v11, %v86_v11 }
  0x5f   :  { %251 = vmatpush1.bf16.msra.mxu0 %v501_v4  ;;  %323 = vmatpush1.msra.mxu1 %v316_v15  ;;  %v513_v18 = vld [vmem:[#allocation8 + $0x50] ss:$8 sps:$4 sm:$0xff]   ;;  %v516_v20 = vld [vmem:[#allocation8 + $0x60] ss:$8 sps:$4 sm:$0xff]   ;;  %v517_v21 = vld [vmem:[#allocation8 + $0x74] ss:$8 sps:$4 sm:$0xff]  }
  0x60   :  { %252 = vmatprep.subr.bf16.mxu0 %v502_v5  ;;  %v90_v17 = vpack.c.bf16 %v458_v14, %v458_v14  ;;  %483 = vmatmul.mubr.msk.f32.vlgmr.msra.gmra.mrb[0].mxu1 %vm318_vm0, %v315_v16  ;;  %v519_v22 = vld [vmem:[#allocation8 + $0x70] ss:$8 sps:$4 sm:$0xff]   ;;  %v520_v23 = vld [vmem:[#allocation8 + $0x84] ss:$8 sps:$4 sm:$0xff]   ;;  %v677_v24 = vmov 65535   ;;  %v117_v43 = vshrl.u32 %v116_v39, 7  ;;  %v296_v50 = vmul.f32 %v292_v45, %v292_v45 }
  0x61   :  { %v240_v25 = vsel %vm238_vm2, 4294967295, %v677_v24  ;;  %v522_v26 = vld [vmem:[#allocation8 + $0x80] ss:$8 sps:$4 sm:$0xff]   ;;  %v523_v27 = vld [vmem:[#allocation8 + $0x94] ss:$8 sps:$4 sm:$0xff]  }
  0x62   :  { %482 = vmatprep.mubr.msk.bf16.mxu0 %vm234_vm1, %v90_v17  ;;  %v526_v28 = vld [vmem:[#allocation8 + $0xa4] ss:$8 sps:$4 sm:$0x1f]   ;;  %v241_v29 = vsel %vm239_vm3, %v240_v25, 0  ;;  %v525_v30 = vld [vmem:[#allocation8 + $0x90] ss:$8 sps:$4 sm:$0xff]  }
  0x63   :  { %253 = vmatpush1.bf16.msra.mxu0 %v504_v6  ;;  %v528_v31 = vld [vmem:[#allocation8 + $0xa0] ss:$8 sps:$4 sm:$0x1f]   ;;  %v85_v32 = vld [vmem:[#allocation2] sm:$0xff]  ;;  %v246_v33 = vand.u32 %v526_v28, %v241_v29  ;;  %v290_v41 = vld [vmem:[#allocation5 + $0x8] sm:$0xff]  ;;  %v118_v48 = vsub.s32 0, %v117_v43 }
  0x64   :  { %254 = vmatprep.subr.bf16.mxu0 %v505_v7  ;;  %v457_v34 = vadd.f32 -300.0, %v85_v32  ;;  %v243_v35 = vand.u32 %v528_v31, %v241_v29  ;;  %v289_v40 = vld [vmem:[#allocation5] sm:$0xff]  ;;  %v291_v42 = vmul.f32 %v85_v32, %v85_v32  ;;  %v294_v46 = vmul.f32 %v290_v41, %v290_v41  ;;  %v301_v52 = vld [vmem:[%s806_s5] ss:$2 sm:$0x3] }
  0x65   :  { %v293_v44 = vmul.f32 %v289_v40, %v289_v40  ;;  %v122_v51 = vsub.s32 1, %v117_v43  ;;  %v459_v54 = vld [vmem:[%s806_s5 + $0x1] ss:$2 sm:$0x3]  ;;  %v306_v56 = vrot.slane %v301_v52, %v118_v48  ;;  %vm423_vm4 = vcmp.lt.s32.totalorder %v117_v43, 2  ;;  %s678_s5 = smov [#allocation11]  }
  0x66   :  { %v89_v36 = vpack.c.bf16 %v457_v34, %v457_v34  ;;  %v295_v47 = vmul.f32 %v291_v42, %v291_v42  ;;  %v298_v53 = vmul.f32 %v294_v46, %v294_v46  ;;  %v119_v59 = vrot.slane %v459_v54, %v118_v48  ;;  %s446_s3 = sshll.u32 %s678_s5, 4  ;;  %s447_s3 = int_to_ptr.vmem [resolvable:$true] %s446_s3 }
  0x67   :  { %255 = vmatpush1.bf16.msra.mxu0 %v507_v8  ;;  %v297_v49 = vmul.f32 %v293_v44, %v293_v44  ;;  %v310_v58 = vrot.slane %v301_v52, %v122_v51  ;;  %v123_v60 = vrot.slane %v459_v54, %v122_v51  ;;  %s639_s10 = scalar_lea.vmem %s447_s3, 128  ;;  %p644_p13 = scmp.lt.s32.totalorder %s447_s3, %s447_s3 }
  0x68   :  { %256 = vmatprep.subr.bf16.mxu0 %v508_v9  ;;  %v300_v57 = vsub.f32 %v296_v50, %v298_v53  ;;  %p640_p12 = scmp.ne.s32.totalorder %s447_s3, %s639_s10  ;;  %p645_p0 = scmp.lt.s32.totalorder %s639_s10, %s639_s10 }
  0x69   :  { %v299_v55 = vsub.f32 %v295_v47, %v297_v49 }
  0x6a   :  { %v314_v63 = vmul.f32 %v310_v58, %v300_v57  ;;  %p646_p1 = por %p645_p0, %p644_p13 }
  0x6b   :  { %257 = vmatpush1.bf16.msra.mxu0 %v510_v10  ;;  %v313_v61 = vmul.f32 %v306_v56, %v299_v55 }
  0x6c   :  { %258 = vmatprep.subr.bf16.mxu0 %v511_v13  ;;  %p647_p2 = pnand %p646_p1, %p640_p12 }
  0x6f   :  { %259 = vmatpush1.bf16.msra.mxu0 %v513_v18 }
  0x70   :  { %260 = vmatprep.subr.bf16.mxu0 %v514_v19 }
  0x73   :  { %261 = vmatpush1.bf16.msra.mxu0 %v516_v20 }
  0x74   :  { %262 = vmatprep.subr.bf16.mxu0 %v517_v21 }
  0x77   :  { %263 = vmatpush1.bf16.msra.mxu0 %v519_v22 }
  0x78   :  { %264 = vmatprep.subr.bf16.mxu0 %v520_v23 }
  0x7b   :  { %265 = vmatpush1.bf16.msra.mxu0 %v522_v26 }
  0x7c   :  { %266 = vmatprep.subr.bf16.mxu0 %v523_v27 }
  0x7f   :  { %267 = vmatpush1.bf16.msra.mxu0 %v525_v30 }
  0x80   :  { %268 = vmatprep.subr.bf16.mxu0 %v246_v33 }
  0x83   :  { %269 = vmatpush1.bf16.msra.mxu0 %v243_v35 }
  0x86   :  { %281 = vmatmul.mubr.bf16.vlgmr.msra.gmra.mrb[0].mxu0 %v89_v36 }
 0x133   :  { %v388_v37 = vpop.f32.mrb[0].mxu1 }
 0x134   :  { %v390_v38 = vpop.f32.mrb[1].mxu1 }
 0x159   :  { %v282_v62 = vpop.f32.mrb[0].mxu0 }
 0x15a   :  { %v283_v0 = vadd.f32 %v282_v62, %v119_v59  ;;  %v284_v1 = vpop.f32.mrb[1].mxu0 }
 0x15b   :  { %v285_v2 = vadd.f32 %v284_v1, %v123_v60  ;;  %v286_v3 = vpop.f32.mrb[2].mxu0 }
 0x15c   :  { %v287_v4 = vpop.f32.mrb[3].mxu0  ;;  %v393_v5 = vadd.f32 %v313_v61, %v283_v0 }
 0x15d   :  { %v394_v6 = vadd.f32 %v314_v63, %v285_v2 }
 0x15e   :  { %v395_v7 = vsub.f32 %v393_v5, %v388_v37 }
 0x15f   :  { %v396_v8 = vsub.f32 %v394_v6, %v390_v38 }
 0x160   :  { %v397_v9 = vand.u32 2147483647, %v395_v7 }
 0x161   :  { %v398_v10 = vand.u32 2147483647, %v396_v8 }
 0x162   :  { %v424_v12 = vsel %vm423_vm4, %v397_v9, 0.0 }
 0x163   :  { %v425_v11 = vsel %vm423_vm4, %v398_v10, 0.0 }
 0x164   :  { %v426_v13 = vsel %vm234_vm1, %v425_v11, 0.0 }
 0x165   :  { %v427_v14 = vadd.f32 %v426_v13, %v424_v12 }
 0x167   :  { %428 = vadd.xlane.f32.xlu0 %v427_v14 }
 0x1f4   :  { %v429_v15 = vpop.xlane.xlu0 %428 }
 0x1f5   :  { %v430_v16 = vrot.slane %v429_v15, 4 }
 0x1f7   :  { %v431_v17 = vadd.f32 %v430_v16, %v429_v15 }
 0x1f9   :  { %v432_v18 = vrot.slane %v431_v17, 2 }
 0x1fb   :  { %v433_v19 = vadd.f32 %v432_v18, %v431_v17 }
 0x1fd   :  { %v434_v20 = vrot.slane %v433_v19, 1 }
 0x1ff   :  { %v435_v21 = vadd.f32 %v434_v20, %v433_v19 }
 0x201   :  { %484 = vpush %v435_v21 }
 0x232   :  { %s485_s24 = spop %484 }
 0x233   :  { %v437_v22 = vstv %s485_s24 }
 0x234   :  { %439 = vst [vmem:[#allocation11] sm:$0xff] %v437_v22 }
 0x235   :  { %650 = shalt.err (!%p647_p2)
}
 0x236   :  { %s651_s13 = scalar_lea.hbm %s807_s6, 128 }
 0x237   :  { %p652_p3 = scmp.ne.s32.totalorder %s807_s6, %s651_s13  ;;  %p655_p4 = scmp.lt.u32.totalorder %s651_s13, %s807_s6 }
 0x239   :  { %p657_p5 = pnand %p655_p4, %p652_p3 }
 0x23b   :  { %660 = shalt.err (!%p657_p5)
}
 0x23c   :  { %449 = dma.vmem_to_hbm [thread:$0]  %s447_s3, 128, %s807_s6, [#allocation4]  }
 0x23d   :  { %667 = dma.done.wait [#allocation4], 128  }
 0x23e   :  { %668 = vsyncadd [#allocation4], 4294967168 }
 0x23f   :  { %453 = vsyncpa [#allocation3], 1 }
 0x240   :  { %454 = vsyncpa [#allocation6], 1 }
 0x241   :  { %455 = vsyncpa [#allocation9], 1 }
 0x242   :  { %456 = vsyncpa [#allocation4], 1 }

</bundles_post_ra>
